<compile_context>
chip_gen: v7x
topology: tpu7x:2x2x1
jax: 0.10.0
libtpu: 0.0.40
codegen_flags: <defaults>
</compile_context>

<pallas_src>
import jax
import jax.numpy as jnp
from jax.experimental import pallas as pl
from jax.experimental.pallas import tpu as pltpu

_LANE = 128


def _round_up(x, m):
    return ((x + m - 1) // m) * m


def _make_mlp_kernel(num_layers, compute_dtype):
    def kernel(x_ref, *refs):
        # refs = (w0, b0, w1, b1, ..., w_{L-1}, b_{L-1}, o_ref)
        o_ref = refs[-1]
        y = x_ref[...]                                  # (tm, din), compute_dtype
        for i in range(num_layers):
            w = refs[2 * i][...]                        # (in_i_pad, out_i_pad), compute_dtype
            b = refs[2 * i + 1][...]                    # (1, out_i_pad), f32
            # MXU matmul with f32 accumulation; bias add in f32 on the VPU.
            y = jnp.dot(y, w, preferred_element_type=jnp.float32) + b
            if i < num_layers - 1:
                # ReLU in f32 (v5e VPU has no bf16 ALU), then cast for next MXU pass.
                y = jnp.maximum(y, 0.0).astype(compute_dtype)
        o_ref[...] = y.astype(o_ref.dtype)

    return kernel


def _const_block_spec(shape):
    """Whole-array, grid-invariant block; single-buffered (params never change)."""
    index_map = lambda i: (0,) * len(shape)
    try:
        return pl.BlockSpec(shape, index_map, pipeline_mode=pl.Buffered(1))
    except TypeError:  # older BlockSpec signature without pipeline_mode
        return pl.BlockSpec(shape, index_map)


def mlp_forward(x, weights, biases, *, compute_dtype=jnp.bfloat16, tm_max=4096,
                vmem_budget_bytes=None, vmem_limit_bytes=None):
    """Fused Pallas MLP forward.

    weights[i]: (in_i, out_i)  (transposed vs PyTorch), biases[i]: (out_i,).
    """
    num_layers = len(weights)
    orig_shape = x.shape
    din = int(orig_shape[-1])
    dout = int(weights[-1].shape[1])
    out_dtype = x.dtype

    # --- Generation-aware VMEM sizing (v5e/v6e: 128 MiB physical, v7x: 64 MiB/TC).
    if vmem_limit_bytes is None or vmem_budget_bytes is None:
        try:
            phys = int(pltpu.get_tpu_info().vmem_capacity_bytes)
        except Exception:
            phys = 64 << 20  # conservative default (v7x per-TC)
        if vmem_limit_bytes is None:
            vmem_limit_bytes = min((3 * phys) // 4, 100 << 20)
        if vmem_budget_bytes is None:
            vmem_budget_bytes = (4 * vmem_limit_bytes) // 5

    # --- Lane-dense params: zero-pad every layer's output dim (and the next
    #     layer's input dim) up to a multiple of 128.  Din stays unpadded.
    # TODO(synk): pad to 256 on v6e/v7x (2x256^2 MXU) once generation dispatch is worth it.
    ws, bs = [], []
    prev = din
    for w, b in zip(weights, biases):
        in_d, out_d = int(w.shape[0]), int(w.shape[1])
        out_pad = _round_up(out_d, _LANE)
        w_p = jnp.pad(w, ((0, prev - in_d), (0, out_pad - out_d))).astype(compute_dtype)
        b_p = jnp.pad(b.reshape(1, -1), ((0, 0), (0, out_pad - out_d))).astype(jnp.float32)
        ws.append(w_p)
        bs.append(b_p)
        prev = out_pad
    dout_pad = prev
    layer_outs = [int(w.shape[1]) for w in ws]

    x2d = x.reshape(-1, din).astype(compute_dtype)
    n = x2d.shape[0]

    # --- Row tile: as large as possible within the VMEM budget.
    itemsize_c = jnp.dtype(compute_dtype).itemsize
    itemsize_o = jnp.dtype(out_dtype).itemsize
    # Weights/biases are single-buffered VMEM residents.
    fixed_bytes = sum(w.size * itemsize_c for w in ws) + sum(b.size * 4 for b in bs)
    per_row_bytes = (2 * din * itemsize_c              # double-buffered input block
                     + 2 * dout_pad * itemsize_o       # double-buffered output block
                     + sum(layer_outs) * (4 + itemsize_c))  # f32 intermediates + compute-dtype copies
    tm_budget = max(8, (vmem_budget_bytes - fixed_bytes) // per_row_bytes)
    tm = max(8, min(tm_max, _round_up(n, 8), (tm_budget // 8) * 8))

    # Ragged last block handled by Pallas: no jnp.pad -> no extra HBM copy of x.
    grid = (pl.cdiv(n, tm),)

    # --- BlockSpecs: row-tiled x/out, whole-array constant-index single-buffered params.
    in_specs = [pl.BlockSpec((tm, din), lambda i: (i, 0))]
    flat_params = []
    for w, b in zip(ws, bs):
        in_specs.append(_const_block_spec(w.shape))
        in_specs.append(_const_block_spec(b.shape))
        flat_params.extend((w, b))
    out_spec = pl.BlockSpec((tm, dout_pad), lambda i: (i, 0))

    out = pl.pallas_call(
        _make_mlp_kernel(num_layers, compute_dtype),
        out_shape=jax.ShapeDtypeStruct((n, dout_pad), out_dtype),
        grid=grid,
        in_specs=in_specs,
        out_specs=out_spec,
        compiler_params=pltpu.CompilerParams(
            # TODO(synk): if a v7x profile shows a single active TC, switch this axis
            # to pltpu.CORE_PARALLEL (or pl.core_map over a tensorcore mesh).
            dimension_semantics=("parallel",),
            vmem_limit_bytes=int(vmem_limit_bytes),
        ),
    )(x2d, *flat_params)

    return out[:, :dout].reshape(*orig_shape[:-1], dout)


def init_mlp_params(key, input_dim, hidden_dim, output_dim, num_layers):
    """Deterministic init mirroring nn.Linear's uniform(-1/sqrt(fan_in), +) bounds."""
    h = [hidden_dim] * (num_layers - 1)
    dims_in = [input_dim] + h
    dims_out = h + [output_dim]
    weights, biases = [], []
    for n_in, n_out in zip(dims_in, dims_out):
        key, kw, kb = jax.random.split(key, 3)
        bound = 1.0 / jnp.sqrt(n_in)
        # Stored as (in, out): transpose of PyTorch's (out, in) weight layout.
        w = jax.random.uniform(kw, (n_in, n_out), jnp.float32, -bound, bound)
        b = jax.random.uniform(kb, (n_out,), jnp.float32, -bound, bound)
        weights.append(w)
        biases.append(b)
    return weights, biases


if __name__ == "__main__":
    key = jax.random.PRNGKey(0)
    batch, seq = 2, 8
    input_dim, hidden_dim, output_dim, num_layers = 32, 64, 16, 3

    kx, kp = jax.random.split(key)
    x = jax.random.normal(kx, (batch, seq, input_dim), dtype=jnp.float32)
    weights, biases = init_mlp_params(kp, input_dim, hidden_dim, output_dim, num_layers)

    out = mlp_forward(x, weights, biases)
    out = jax.block_until_ready(out)

    # Pure-JAX reference with the same bf16-matmul / f32-accumulate recipe.
    ref = x.reshape(-1, input_dim)
    for i, (w, b) in enumerate(zip(weights, biases)):
        ref = jnp.dot(ref.astype(jnp.bfloat16), w.astype(jnp.bfloat16),
                      preferred_element_type=jnp.float32) + b
        if i < num_layers - 1:
            ref = jnp.maximum(ref, 0.0)
    ref = ref.reshape(batch, seq, output_dim)

    assert out.shape == (batch, seq, output_dim)
    assert jnp.allclose(out, ref, atol=1e-2, rtol=1e-2), float(jnp.max(jnp.abs(out - ref)))

    print("KERNEL_OK")
</pallas_src>

<mosaic_0001>
module attributes {stable_mosaic.version = 11 : i64} {
  func.func @kernel(%arg0: i32, %arg1: memref<16x32xbf16, #tpu.memory_space<vmem>>, %arg2: memref<32x128xbf16, #tpu.memory_space<vmem>>, %arg3: memref<1x128xf32, #tpu.memory_space<vmem>>, %arg4: memref<128x128xbf16, #tpu.memory_space<vmem>>, %arg5: memref<1x128xf32, #tpu.memory_space<vmem>>, %arg6: memref<128x128xbf16, #tpu.memory_space<vmem>>, %arg7: memref<1x128xf32, #tpu.memory_space<vmem>>, %arg8: memref<16x128xf32, #tpu.memory_space<vmem>>) attributes {dimension_semantics = [#tpu.dimension_semantics<parallel>], iteration_bounds = array<i64: 1>, scalar_prefetch = 0 : i64, scratch_operands = 0 : i64, tpu.core_type = #tpu.core_type<tc>, window_params = [{transform_indices = @transform_0, window_bounds = array<i64: 16, 32>}, {pipeline_mode = #tpu.pipeline_mode<synchronous>, transform_indices = @transform_1, window_bounds = array<i64: 32, 128>}, {pipeline_mode = #tpu.pipeline_mode<synchronous>, transform_indices = @transform_2, window_bounds = array<i64: 1, 128>}, {pipeline_mode = #tpu.pipeline_mode<synchronous>, transform_indices = @transform_3, window_bounds = array<i64: 128, 128>}, {pipeline_mode = #tpu.pipeline_mode<synchronous>, transform_indices = @transform_4, window_bounds = array<i64: 1, 128>}, {pipeline_mode = #tpu.pipeline_mode<synchronous>, transform_indices = @transform_5, window_bounds = array<i64: 128, 128>}, {pipeline_mode = #tpu.pipeline_mode<synchronous>, transform_indices = @transform_6, window_bounds = array<i64: 1, 128>}, {transform_indices = @transform_7, window_bounds = array<i64: 16, 128>}]} {
    %c0 = arith.constant 0 : index
    %c0_0 = arith.constant 0 : index
    %0 = vector.load %arg1[%c0, %c0_0] : memref<16x32xbf16, #tpu.memory_space<vmem>>, vector<16x32xbf16>
    %c0_1 = arith.constant 0 : index
    %c0_2 = arith.constant 0 : index
    %1 = vector.load %arg2[%c0_1, %c0_2] : memref<32x128xbf16, #tpu.memory_space<vmem>>, vector<32x128xbf16>
    %c0_3 = arith.constant 0 : index
    %c0_4 = arith.constant 0 : index
    %2 = vector.load %arg3[%c0_3, %c0_4] : memref<1x128xf32, #tpu.memory_space<vmem>>, vector<1x128xf32>
    %cst = arith.constant dense<0.000000e+00> : vector<16x128xf32>
    %3 = tpu.matmul %0, %1, %cst {dimension_numbers = #tpu.dot_dimension_numbers<[1], [0], [0], [1], [0, 0, 1, 1], [], []>} : vector<16x32xbf16>, vector<32x128xbf16>, vector<16x128xf32> -> vector<16x128xf32>
    %4 = vector.broadcast %2 : vector<1x128xf32> to vector<16x128xf32>
    %5 = arith.addf %3, %4 : vector<16x128xf32>
    %cst_5 = arith.constant 0.000000e+00 : f32
    %6 = vector.broadcast %cst_5 : f32 to vector<16x128xf32>
    %7 = arith.maximumf %5, %6 : vector<16x128xf32>
    %8 = arith.truncf %7 : vector<16x128xf32> to vector<16x128xbf16>
    %c0_6 = arith.constant 0 : index
    %c0_7 = arith.constant 0 : index
    %9 = vector.load %arg4[%c0_6, %c0_7] : memref<128x128xbf16, #tpu.memory_space<vmem>>, vector<128x128xbf16>
    %c0_8 = arith.constant 0 : index
    %c0_9 = arith.constant 0 : index
    %10 = vector.load %arg5[%c0_8, %c0_9] : memref<1x128xf32, #tpu.memory_space<vmem>>, vector<1x128xf32>
    %cst_10 = arith.constant dense<0.000000e+00> : vector<16x128xf32>
    %11 = tpu.matmul %8, %9, %cst_10 {dimension_numbers = #tpu.dot_dimension_numbers<[1], [0], [0], [1], [0, 0, 1, 1], [], []>} : vector<16x128xbf16>, vector<128x128xbf16>, vector<16x128xf32> -> vector<16x128xf32>
    %12 = vector.broadcast %10 : vector<1x128xf32> to vector<16x128xf32>
    %13 = arith.addf %11, %12 : vector<16x128xf32>
    %cst_11 = arith.constant 0.000000e+00 : f32
    %14 = vector.broadcast %cst_11 : f32 to vector<16x128xf32>
    %15 = arith.maximumf %13, %14 : vector<16x128xf32>
    %16 = arith.truncf %15 : vector<16x128xf32> to vector<16x128xbf16>
    %c0_12 = arith.constant 0 : index
    %c0_13 = arith.constant 0 : index
    %17 = vector.load %arg6[%c0_12, %c0_13] : memref<128x128xbf16, #tpu.memory_space<vmem>>, vector<128x128xbf16>
    %c0_14 = arith.constant 0 : index
    %c0_15 = arith.constant 0 : index
    %18 = vector.load %arg7[%c0_14, %c0_15] : memref<1x128xf32, #tpu.memory_space<vmem>>, vector<1x128xf32>
    %cst_16 = arith.constant dense<0.000000e+00> : vector<16x128xf32>
    %19 = tpu.matmul %16, %17, %cst_16 {dimension_numbers = #tpu.dot_dimension_numbers<[1], [0], [0], [1], [0, 0, 1, 1], [], []>} : vector<16x128xbf16>, vector<128x128xbf16>, vector<16x128xf32> -> vector<16x128xf32>
    %20 = vector.broadcast %18 : vector<1x128xf32> to vector<16x128xf32>
    %21 = arith.addf %19, %20 : vector<16x128xf32>
    %c0_17 = arith.constant 0 : index
    %c0_18 = arith.constant 0 : index
    %22 = vector.load %arg8[%c0_17, %c0_18] : memref<16x128xf32, #tpu.memory_space<vmem>>, vector<16x128xf32>
    tpu.vector_store %arg8[%c0_17, %c0_18], %21 {strides = array<i32>} : memref<16x128xf32, #tpu.memory_space<vmem>>, vector<16x128xf32>,
    return
  }
  func.func @transform_0(%arg0: i32) -> (i32, i32) {
    %c0_i32 = arith.constant 0 : i32
    %c0_i32_0 = arith.constant 0 : i32
    return %arg0, %c0_i32 : i32, i32
  }
  func.func @transform_1(%arg0: i32) -> (i32, i32) {
    %c0_i32 = arith.constant 0 : i32
    %c0_i32_0 = arith.constant 0 : i32
    %c0_i32_1 = arith.constant 0 : i32
    return %c0_i32, %c0_i32_0 : i32, i32
  }
  func.func @transform_2(%arg0: i32) -> (i32, i32) {
    %c0_i32 = arith.constant 0 : i32
    %c0_i32_0 = arith.constant 0 : i32
    %c0_i32_1 = arith.constant 0 : i32
    return %c0_i32, %c0_i32_0 : i32, i32
  }
  func.func @transform_3(%arg0: i32) -> (i32, i32) {
    %c0_i32 = arith.constant 0 : i32
    %c0_i32_0 = arith.constant 0 : i32
    %c0_i32_1 = arith.constant 0 : i32
    return %c0_i32, %c0_i32_0 : i32, i32
  }
  func.func @transform_4(%arg0: i32) -> (i32, i32) {
    %c0_i32 = arith.constant 0 : i32
    %c0_i32_0 = arith.constant 0 : i32
    %c0_i32_1 = arith.constant 0 : i32
    return %c0_i32, %c0_i32_0 : i32, i32
  }
  func.func @transform_5(%arg0: i32) -> (i32, i32) {
    %c0_i32 = arith.constant 0 : i32
    %c0_i32_0 = arith.constant 0 : i32
    %c0_i32_1 = arith.constant 0 : i32
    return %c0_i32, %c0_i32_0 : i32, i32
  }
  func.func @transform_6(%arg0: i32) -> (i32, i32) {
    %c0_i32 = arith.constant 0 : i32
    %c0_i32_0 = arith.constant 0 : i32
    %c0_i32_1 = arith.constant 0 : i32
    return %c0_i32, %c0_i32_0 : i32, i32
  }
  func.func @transform_7(%arg0: i32) -> (i32, i32) {
    %c0_i32 = arith.constant 0 : i32
    %c0_i32_0 = arith.constant 0 : i32
    return %arg0, %c0_i32 : i32, i32
  }
}

</mosaic_0001>

<bundles_post_ra>
// kernel: tpu_custom_call.1
= control target key start
LH: loop header
LB: loop body
LE: loop exit
PB: predicated region body
PF: predicated region fallthrough
CT: control target
= control target key end

     0   :  { %12 = vsyncpa [#allocation3], 0  ;;  %s819_s0 = inlined_call_operand.hbm [shape: bf16[16,32], index: 0, kind: input, shape index: {}]   ;;  %s820_s1 = inlined_call_operand.hbm [shape: bf16[32,128], index: 1, kind: input, shape index: {}]   ;;  %s821_s2 = inlined_call_operand.vmem [shape: f32[1,128], index: 2, kind: input, shape index: {}]   ;;  %s822_s3 = inlined_call_operand.hbm [shape: bf16[128,128], index: 3, kind: input, shape index: {}]   ;;  %s823_s4 = inlined_call_operand.vmem [shape: f32[1,128], index: 4, kind: input, shape index: {}]   ;;  %s824_s5 = inlined_call_operand.hbm [shape: bf16[128,128], index: 5, kind: input, shape index: {}]   ;;  %s825_s6 = inlined_call_operand.vmem [shape: f32[1,128], index: 6, kind: input, shape index: {}]   ;;  %s826_s7 = inlined_call_operand.hbm [shape: f32[16,128], index: 7, kind: output, shape index: {}]  }
   0x1   :  { %13 = vsyncpa [#allocation6], 0 }
   0x2   :  { %14 = vsyncpa [#allocation9], 0 }
   0x3   :  { %15 = vsyncpa [#allocation4], 0  ;;  %s649_s24 = smov [#allocation5]   ;;  %s650_s26 = smov [#allocation2]  }
   0x4   :  { %s33_s25 = sshll.u32 %s649_s24, 4  ;;  %s21_s27 = sshll.u32 %s650_s26, 4  ;;  %s34_s25 = int_to_ptr.vmem [resolvable:$true] %s33_s25  ;;  %s700_s27 = int_to_ptr.vmem [resolvable:$true] %s21_s27 }
   0x5   :  { %s531_s30 = scalar_lea.hbm %s820_s1, 256 }
   0x6   :  { %p532_p0 = scmp.ne.s32.totalorder %s820_s1, %s531_s30  ;;  %p535_p1 = scmp.lt.u32.totalorder %s531_s30, %s820_s1 }
   0x8   :  { %p537_p2 = pnand %p535_p1, %p532_p0 }
   0xa   :  { %540 = shalt.err (!%p537_p2)
}
   0xb   :  { %s541_s12 = scalar_lea.vmem %s34_s25, 256  ;;  %p546_p4 = scmp.lt.s32.totalorder %s34_s25, %s34_s25 }
   0xc   :  { %p542_p3 = scmp.ne.s32.totalorder %s34_s25, %s541_s12  ;;  %p547_p5 = scmp.lt.s32.totalorder %s541_s12, %s541_s12 }
   0xe   :  { %p548_p6 = por %p547_p5, %p546_p4 }
  0x10   :  { %p549_p7 = pnand %p548_p6, %p542_p3 }
  0x12   :  { %552 = shalt.err (!%p549_p7)
}
  0x13   :  { %s651_s13 = smov 64   ;;  %s652_s14 = smov 4  }
  0x14   :  { %39 = dma.hbm_to_vmem [thread:$0]  %s820_s1, 256, %s34_s25, [#allocation6], %s651_s13, %s651_s13, %s652_s14  }
  0x15   :  { %s553_s19 = scalar_lea.hbm %s819_s0, 128 }
  0x16   :  { %p554_p8 = scmp.ne.s32.totalorder %s819_s0, %s553_s19  ;;  %p557_p9 = scmp.lt.u32.totalorder %s553_s19, %s819_s0 }
  0x18   :  { %p559_p10 = pnand %p557_p9, %p554_p8 }
  0x1a   :  { %562 = shalt.err (!%p559_p10)
}
  0x1b   :  { %s563_s24 = scalar_lea.vmem %s700_s27, 128  ;;  %p568_p12 = scmp.lt.s32.totalorder %s700_s27, %s700_s27 }
  0x1c   :  { %p564_p11 = scmp.ne.s32.totalorder %s700_s27, %s563_s24  ;;  %p569_p13 = scmp.lt.s32.totalorder %s563_s24, %s563_s24 }
  0x1e   :  { %p570_p0 = por %p569_p13, %p568_p12 }
  0x20   :  { %p571_p1 = pnand %p570_p0, %p564_p11 }
  0x22   :  { %574 = shalt.err (!%p571_p1)
}
  0x23   :  { %27 = dma.hbm_to_vmem [thread:$0]  %s819_s0, 128, %s700_s27, [#allocation3], %s651_s13, %s651_s13, %s652_s14  }
  0x24   :  { %s653_s26 = smov [#allocation7]   ;;  %s654_s29 = smov [#allocation8]  }
  0x25   :  { %s47_s28 = sshll.u32 %s653_s26, 4  ;;  %s61_s30 = sshll.u32 %s654_s29, 4  ;;  %s48_s28 = int_to_ptr.vmem [resolvable:$true] %s47_s28  ;;  %s737_s30 = int_to_ptr.vmem [resolvable:$true] %s61_s30 }
  0x26   :  { %s575_s10 = scalar_lea.hbm %s822_s3, 1024 }
  0x27   :  { %p576_p2 = scmp.ne.s32.totalorder %s822_s3, %s575_s10  ;;  %p579_p3 = scmp.lt.u32.totalorder %s575_s10, %s822_s3 }
  0x29   :  { %p581_p4 = pnand %p579_p3, %p576_p2 }
  0x2b   :  { %584 = shalt.err (!%p581_p4)
}
  0x2c   :  { %s585_s0 = scalar_lea.vmem %s48_s28, 1024  ;;  %p590_p6 = scmp.lt.s32.totalorder %s48_s28, %s48_s28 }
  0x2d   :  { %p586_p5 = scmp.ne.s32.totalorder %s48_s28, %s585_s0  ;;  %p591_p7 = scmp.lt.s32.totalorder %s585_s0, %s585_s0 }
  0x2f   :  { %p592_p8 = por %p591_p7, %p590_p6 }
  0x31   :  { %p593_p9 = pnand %p592_p8, %p586_p5 }
  0x33   :  { %596 = shalt.err (!%p593_p9)
}
  0x34   :  { %53 = dma.hbm_to_vmem [thread:$0]  %s822_s3, 1024, %s48_s28, [#allocation6], %s651_s13, %s651_s13, %s652_s14  }
  0x35   :  { %s597_s20 = scalar_lea.hbm %s824_s5, 1024 }
  0x36   :  { %p598_p10 = scmp.ne.s32.totalorder %s824_s5, %s597_s20  ;;  %p601_p11 = scmp.lt.u32.totalorder %s597_s20, %s824_s5 }
  0x38   :  { %p603_p12 = pnand %p601_p11, %p598_p10 }
  0x3a   :  { %606 = shalt.err (!%p603_p12)
}
  0x3b   :  { %s607_s1 = scalar_lea.vmem %s737_s30, 1024  ;;  %p612_p0 = scmp.lt.s32.totalorder %s737_s30, %s737_s30 }
  0x3c   :  { %p608_p13 = scmp.ne.s32.totalorder %s737_s30, %s607_s1  ;;  %p613_p1 = scmp.lt.s32.totalorder %s607_s1, %s607_s1 }
  0x3e   :  { %p614_p2 = por %p613_p1, %p612_p0 }
  0x40   :  { %p615_p3 = pnand %p614_p2, %p608_p13 }
  0x42   :  { %618 = shalt.err (!%p615_p3)
}
  0x43   :  { %67 = dma.hbm_to_vmem [thread:$0]  %s824_s5, 1024, %s737_s30, [#allocation9], %s651_s13, %s651_s13, %s652_s14  }
  0x44   :  { %641 = dma.done.wait [#allocation3], 128  }
  0x45   :  { %642 = vsyncadd [#allocation3], 4294967168 }
  0x46   :  { %643 = dma.done.wait [#allocation6], 1280  }
  0x47   :  { %644 = vsyncadd [#allocation6], 4294966016 }
  0x48   :  { %645 = dma.done.wait [#allocation9], 1024  }
  0x49   :  { %646 = vsyncadd [#allocation9], 4294966272  ;;  %v655_v0 = vmov 0.0   ;;  %vm656_vm0 = vmmov 0   ;;  %v512_v1 = vld [vmem:[#allocation5] sm:$0xff]   ;;  %v513_v2 = vld [vmem:[#allocation5 + $0x8] sm:$0xff]  }
  0x4a   :  { %453 = vmatprep.subr.bf16.mxu0 %v655_v0  ;;  %457 = vmatprep.mubr.msk.bf16.mxu0 %vm656_vm0, %v655_v0  ;;  %v515_v3 = vld [vmem:[#allocation7] sm:$0xff]   ;;  %v514_v4 = vld [vmem:[#allocation2] sm:$0xff]   ;;  %vm113_vm1 = vcmask 261120   ;;  %v517_v6 = vld [vmem:[#allocation7 + $0x10] sm:$0xff]   ;;  %s657_s29 = smov [#allocation10]  }
  0x4b   :  { %461 = vmatprep.subr.bf16.mxu1 %v655_v0  ;;  %477 = vmatprep.mubr.msk.bf16.mxu1 %vm656_vm0, %v655_v0  ;;  %v516_v5 = vld [vmem:[#allocation7 + $0x8] sm:$0xff]   ;;  %v518_v7 = vld [vmem:[#allocation7 + $0x18] sm:$0xff]   ;;  %v519_v8 = vld [vmem:[#allocation7 + $0x20] sm:$0xff]   ;;  %s395_s30 = sshll.u32 %s657_s29, 4  ;;  %s396_s30 = int_to_ptr.vmem [resolvable:$true] %s395_s30 }
  0x4c   :  { %454 = vmatpush3.bf16.msra.mxu0 %v512_v1  ;;  %462 = vmatpush3.bf16.msra.mxu1 %v515_v3  ;;  %v520_v9 = vld [vmem:[#allocation7 + $0x28] sm:$0xff]   ;;  %v521_v10 = vld [vmem:[#allocation7 + $0x30] sm:$0xff]   ;;  %v522_v11 = vld [vmem:[#allocation7 + $0x38] sm:$0xff]   ;;  %p624_p5 = scmp.lt.s32.totalorder %s396_s30, %s396_s30 }
  0x4d   :  { %455 = vmatprep.subr.bf16.mxu0 %v655_v0  ;;  %463 = vmatprep.subr.bf16.mxu1 %v655_v0  ;;  %v523_v12 = vld [vmem:[#allocation8] sm:$0xff]   ;;  %v524_v13 = vld [vmem:[#allocation8 + $0x8] sm:$0xff]   ;;  %v525_v14 = vld [vmem:[#allocation8 + $0x10] sm:$0xff]  }
  0x4e   :  { %v526_v15 = vld [vmem:[#allocation8 + $0x18] sm:$0xff]   ;;  %v527_v16 = vld [vmem:[#allocation8 + $0x20] sm:$0xff]   ;;  %v528_v17 = vld [vmem:[#allocation8 + $0x28] sm:$0xff]  }
  0x4f   :  { %v409_v18 = vld [vmem:[%s821_s2] ss:$0 sm:$0xff]  ;;  %v529_v28 = vld [vmem:[#allocation8 + $0x30] sm:$0xff]   ;;  %v530_v29 = vld [vmem:[#allocation8 + $0x38] sm:$0xff]  }
  0x50   :  { %456 = vmatpush3.bf16.msra.mxu0 %v513_v2  ;;  %464 = vmatpush3.bf16.msra.mxu1 %v516_v5  ;;  %v414_v30 = vld [vmem:[%s823_s4] ss:$0 sm:$0xff]  ;;  %s619_s4 = scalar_lea.vmem %s396_s30, 256 }
  0x51   :  { %481 = vmatprep.subr.bf16.mxu0 %v655_v0  ;;  %465 = vmatprep.subr.bf16.mxu1 %v655_v0  ;;  %v423_v40 = vld [vmem:[%s825_s6] ss:$0 sm:$0xff]  ;;  %p620_p4 = scmp.ne.s32.totalorder %s396_s30, %s619_s4  ;;  %p625_p6 = scmp.lt.s32.totalorder %s619_s4, %s619_s4 }
  0x53   :  { %458 = vmatmul.mubr.msk.bf16.vlgmr.msra.gmra.mrb[0].mxu0 %vm113_vm1, %v514_v4  ;;  %p626_p7 = por %p625_p6, %p624_p5 }
  0x54   :  { %497 = vmatprep.mubr.msk.bf16.mxu0 %vm656_vm0, %v655_v0  ;;  %466 = vmatpush3.bf16.msra.mxu1 %v517_v6 }
  0x55   :  { %467 = vmatprep.subr.bf16.mxu1 %v655_v0  ;;  %482 = vmatpush3.bf16.msra.mxu0 %v523_v12  ;;  %p627_p8 = pnand %p626_p7, %p620_p4 }
  0x56   :  { %483 = vmatprep.subr.bf16.mxu0 %v655_v0 }
  0x58   :  { %468 = vmatpush3.bf16.msra.mxu1 %v518_v7 }
  0x59   :  { %469 = vmatprep.subr.bf16.mxu1 %v655_v0  ;;  %484 = vmatpush3.bf16.msra.mxu0 %v524_v13 }
  0x5a   :  { %485 = vmatprep.subr.bf16.mxu0 %v655_v0 }
  0x5c   :  { %470 = vmatpush3.bf16.msra.mxu1 %v519_v8 }
  0x5d   :  { %471 = vmatprep.subr.bf16.mxu1 %v655_v0  ;;  %486 = vmatpush3.bf16.msra.mxu0 %v525_v14 }
  0x5e   :  { %487 = vmatprep.subr.bf16.mxu0 %v655_v0 }
  0x60   :  { %472 = vmatpush3.bf16.msra.mxu1 %v520_v9 }
  0x61   :  { %473 = vmatprep.subr.bf16.mxu1 %v655_v0  ;;  %488 = vmatpush3.bf16.msra.mxu0 %v526_v15 }
  0x62   :  { %489 = vmatprep.subr.bf16.mxu0 %v655_v0 }
  0x64   :  { %474 = vmatpush3.bf16.msra.mxu1 %v521_v10 }
  0x65   :  { %475 = vmatprep.subr.bf16.mxu1 %v655_v0  ;;  %490 = vmatpush3.bf16.msra.mxu0 %v527_v16 }
  0x66   :  { %491 = vmatprep.subr.bf16.mxu0 %v655_v0 }
  0x68   :  { %476 = vmatpush3.bf16.msra.mxu1 %v522_v11 }
  0x69   :  { %492 = vmatpush3.bf16.msra.mxu0 %v528_v17 }
  0x6a   :  { %493 = vmatprep.subr.bf16.mxu0 %v655_v0 }
  0x6d   :  { %494 = vmatpush3.bf16.msra.mxu0 %v529_v28 }
  0x6e   :  { %495 = vmatprep.subr.bf16.mxu0 %v655_v0 }
  0x71   :  { %496 = vmatpush3.bf16.msra.mxu0 %v530_v29 }
 0x126   :  { %v151_v19 = vpop.f32.mrb[0].mxu0 }
 0x127   :  { %v152_v20 = vadd.f32 %v409_v18, %v151_v19  ;;  %v459_v21 = vpop.f32.mrb[1].mxu0 }
 0x128   :  { %v154_v22 = vpop.f32.mrb[2].mxu0 }
 0x129   :  { %v155_v23 = vadd.f32 %v409_v18, %v154_v22  ;;  %v460_v24 = vpop.f32.mrb[3].mxu0  ;;  %v158_v25 = vmax.f32 %v152_v20, 0.0 }
 0x12b   :  { %v159_v26 = vmax.f32 %v155_v23, 0.0 }
 0x12d   :  { %v160_v27 = vpack.c.bf16 %v159_v26, %v158_v25 }
 0x12f   :  { %478 = vmatmul.mubr.bf16.vlgmr.msra.gmra.mrb[0].mxu1 %v160_v27 }
 0x202   :  { %v266_v31 = vpop.f32.mrb[0].mxu1 }
 0x203   :  { %v267_v32 = vadd.f32 %v414_v30, %v266_v31  ;;  %v479_v33 = vpop.f32.mrb[1].mxu1 }
 0x204   :  { %v269_v34 = vpop.f32.mrb[2].mxu1 }
 0x205   :  { %v270_v35 = vadd.f32 %v414_v30, %v269_v34  ;;  %v480_v36 = vpop.f32.mrb[3].mxu1  ;;  %v273_v37 = vmax.f32 %v267_v32, 0.0 }
 0x207   :  { %v274_v38 = vmax.f32 %v270_v35, 0.0 }
 0x209   :  { %v275_v39 = vpack.c.bf16 %v274_v38, %v273_v37 }
 0x20b   :  { %498 = vmatmul.mubr.bf16.vlgmr.msra.gmra.mrb[4].mxu0 %v275_v39 }
 0x2de   :  { %v381_v41 = vpop.f32.mrb[4].mxu0 }
 0x2df   :  { %v382_v42 = vadd.f32 %v423_v40, %v381_v41  ;;  %v499_v43 = vpop.f32.mrb[5].mxu0 }
 0x2e0   :  { %v384_v44 = vpop.f32.mrb[6].mxu0 }
 0x2e1   :  { %388 = vst [vmem:[#allocation10] sm:$0xff] %v382_v42  ;;  %v385_v45 = vadd.f32 %v423_v40, %v384_v44  ;;  %v500_v46 = vpop.f32.mrb[7].mxu0 }
 0x2e3   :  { %389 = vst [vmem:[#allocation10 + $0x8] sm:$0xff] %v385_v45 }
 0x2e4   :  { %630 = shalt.err (!%p627_p8)
}
 0x2e5   :  { %s631_s9 = scalar_lea.hbm %s826_s7, 256 }
 0x2e6   :  { %p632_p9 = scmp.ne.s32.totalorder %s826_s7, %s631_s9  ;;  %p635_p10 = scmp.lt.u32.totalorder %s631_s9, %s826_s7 }
 0x2e8   :  { %p637_p11 = pnand %p635_p10, %p632_p9 }
 0x2ea   :  { %640 = shalt.err (!%p637_p11)
}
 0x2eb   :  { %s658_s16 = smov 128   ;;  %s659_s0 = smov 8  }
 0x2ec   :  { %401 = dma.vmem_to_hbm [thread:$0]  %s396_s30, 256, %s826_s7, [#allocation4], %s658_s16, %s658_s16, %s659_s0  }
 0x2ed   :  { %647 = dma.done.wait [#allocation4], 256  }
 0x2ee   :  { %648 = vsyncadd [#allocation4], 4294967040 }
 0x2ef   :  { %405 = vsyncpa [#allocation3], 1 }
 0x2f0   :  { %406 = vsyncpa [#allocation6], 1 }
 0x2f1   :  { %407 = vsyncpa [#allocation9], 1 }
 0x2f2   :  { %408 = vsyncpa [#allocation4], 1 }

</bundles_post_ra>
